<compile_context>
chip_gen: v6e
topology: v6e:2x2x1
jax: 0.10.0
libtpu: 0.0.40
codegen_flags: <defaults>
</compile_context>

<pallas_src>
import jax
import jax.numpy as jnp
from jax.experimental import pallas as pl
from jax.experimental.pallas import tpu as pltpu


def mlp_kernel(x_ref, w1_ref, b1_ref, w2_ref, b2_ref, w3_ref, b3_ref, o_ref):
    # x arrives in its native dtype (f32); cast to bf16 in-kernel (hidden under DMA).
    x = x_ref[...].astype(jnp.bfloat16)

    # fc1 + ReLU: (TB, 512) @ (512, 256) + (1, 256); f32 accumulation on the MXU.
    h1 = jnp.dot(x, w1_ref[...], preferred_element_type=jnp.float32) + b1_ref[...]
    h1 = jnp.maximum(h1, 0.0).astype(jnp.bfloat16)

    # fc2 + ReLU: (TB, 256) @ (256, 128) + (1, 128)
    h2 = jnp.dot(h1, w2_ref[...], preferred_element_type=jnp.float32) + b2_ref[...]
    h2 = jnp.maximum(h2, 0.0).astype(jnp.bfloat16)

    # fc3, lane-padded to 128 outputs: (TB, 128) @ (128, 128) + (1, 128).
    # Padded bias lanes are -1e30 (f32), so exp() of them is exactly 0 in the softmax.
    logits = jnp.dot(h2, w3_ref[...], preferred_element_type=jnp.float32) + b3_ref[...]

    # Numerically stable softmax over the feature axis (PyTorch dim=1), exact normalization.
    m = jnp.max(logits, axis=-1, keepdims=True)
    e = jnp.exp(logits - m)
    denom = jnp.sum(e, axis=-1, keepdims=True)
    o_ref[...] = (e / denom).astype(o_ref.dtype)


def _round_up(n, m):
    return ((n + m - 1) // m) * m


def _pick_tb(batch, tb):
    # Aim for >= 2 grid steps (megacore on v7x) for mid/large batches; round the tile to a
    # multiple of 16 (bf16 sublane packing); never exceed 2048 rows (v7x 64 MiB VMEM budget).
    half = _round_up(-(-batch // 2), 16)  # ceil(B/2) rounded up to 16
    return max(16, min(tb, half, 2048))


def mlp_forward(x, params, *, tb=1024):
    """x: (B, 512) float. Returns (B, 10) float32 softmax probabilities."""
    B = x.shape[0]
    TB = _pick_tb(B, tb)
    B_pad = _round_up(B, TB)

    xin = x
    if B_pad != B:
        # Only pads when B is not a multiple of TB; no dtype round-trip in HBM.
        xin = jnp.pad(x, ((0, B_pad - B), (0, 0)))

    w1, b1 = params["w1"], params["b1"]
    w2, b2 = params["w2"], params["b2"]
    w3, b3 = params["w3"], params["b3"]  # fc3 padded to 128 output lanes

    grid = (B_pad // TB,)
    const = lambda i: (0, 0)  # weights/biases stay VMEM-resident across batch tiles

    out = pl.pallas_call(
        mlp_kernel,
        out_shape=jax.ShapeDtypeStruct((B_pad, 128), jnp.bfloat16),
        grid=grid,
        in_specs=[
            pl.BlockSpec((TB, 512), lambda i: (i, 0)),   # x tile (pipelined, native dtype)
            pl.BlockSpec((512, 256), const),             # w1 (bf16)
            pl.BlockSpec((1, 256), const),               # b1 (f32)
            pl.BlockSpec((256, 128), const),             # w2 (bf16)
            pl.BlockSpec((1, 128), const),               # b2 (f32)
            pl.BlockSpec((128, 128), const),             # w3 (bf16, zero-padded cols)
            pl.BlockSpec((1, 128), const),               # b3 (f32, -1e30 in padded lanes)
        ],
        out_specs=pl.BlockSpec((TB, 128), lambda i: (i, 0)),
        compiler_params=pltpu.CompilerParams(
            dimension_semantics=("parallel",),           # batch axis shards across TCs (v7x)
        ),
    )(xin, w1, b1, w2, b2, w3, b3)

    return out[:B, :10].astype(jnp.float32)


def mlp_reference(x, params):
    """Pure-JAX reference with the same bf16/f32 numerics as the kernel."""
    xb = x.astype(jnp.bfloat16)
    h1 = jnp.dot(xb, params["w1"], preferred_element_type=jnp.float32) + params["b1"]
    h1 = jnp.maximum(h1, 0.0).astype(jnp.bfloat16)
    h2 = jnp.dot(h1, params["w2"], preferred_element_type=jnp.float32) + params["b2"]
    h2 = jnp.maximum(h2, 0.0).astype(jnp.bfloat16)
    logits = jnp.dot(h2, params["w3"], preferred_element_type=jnp.float32) + params["b3"]
    probs = jax.nn.softmax(logits, axis=-1)
    # Match the kernel's bf16 output quantization.
    return probs[:, :10].astype(jnp.bfloat16).astype(jnp.float32)


def init_params(key):
    """PyTorch nn.Linear-style init (uniform +/- 1/sqrt(fan_in)).
    Weights pre-transposed to (in, out) and cast to bf16; biases kept f32 as (1, out).
    fc3 padded to 128 output lanes (zero weight columns, -1e30 bias in padded lanes)."""
    def linear(k, fan_in, fan_out):
        kw, kb = jax.random.split(k)
        bound = 1.0 / jnp.sqrt(fan_in)
        w = jax.random.uniform(kw, (fan_in, fan_out), jnp.float32, -bound, bound)
        b = jax.random.uniform(kb, (1, fan_out), jnp.float32, -bound, bound)
        return w, b

    k1, k2, k3 = jax.random.split(key, 3)
    w1, b1 = linear(k1, 512, 256)
    w2, b2 = linear(k2, 256, 128)
    w3, b3 = linear(k3, 128, 10)

    # Pad fc3 to a lane-dense 128-wide output. b3 must stay f32 for the -1e30 trick.
    w3p = jnp.zeros((128, 128), jnp.float32).at[:, :10].set(w3)
    b3p = jnp.full((1, 128), -1e30, jnp.float32).at[:, :10].set(b3)

    return {
        "w1": w1.astype(jnp.bfloat16), "b1": b1,
        "w2": w2.astype(jnp.bfloat16), "b2": b2,
        "w3": w3p.astype(jnp.bfloat16), "b3": b3p,
    }


if __name__ == "__main__":
    key = jax.random.PRNGKey(0)
    kp, kx = jax.random.split(key)
    params = init_params(kp)

    B = 8
    x = jax.random.normal(kx, (B, 512), jnp.float32)

    out = mlp_forward(x, params)
    out = jax.block_until_ready(out)

    assert out.shape == (B, 10)

    # Rows are exactly normalized in f32 inside the kernel; bf16 output quantization
    # perturbs the stored probabilities by at most a few 1e-3.
    row_sums = jnp.sum(out, axis=1)
    assert bool(jnp.allclose(row_sums, jnp.ones((B,), jnp.float32), atol=2e-2)), row_sums

    # Compare against a pure-JAX reference with matching bf16/f32 numerics.
    ref = jax.block_until_ready(mlp_reference(x, params))
    assert bool(jnp.allclose(out, ref, atol=1e-2)), jnp.max(jnp.abs(out - ref))

    print("KERNEL_OK")
</pallas_src>

<mosaic_0001>
module attributes {stable_mosaic.version = 11 : i64} {
  func.func @mlp_kernel(%arg0: i32, %arg1: memref<16x512xf32, #tpu.memory_space<vmem>>, %arg2: memref<512x256xbf16, #tpu.memory_space<vmem>>, %arg3: memref<1x256xf32, #tpu.memory_space<vmem>>, %arg4: memref<256x128xbf16, #tpu.memory_space<vmem>>, %arg5: memref<1x128xf32, #tpu.memory_space<vmem>>, %arg6: memref<128x128xbf16, #tpu.memory_space<vmem>>, %arg7: memref<1x128xf32, #tpu.memory_space<vmem>>, %arg8: memref<16x128xbf16, #tpu.memory_space<vmem>>) attributes {dimension_semantics = [#tpu.dimension_semantics<parallel>], iteration_bounds = array<i64: 1>, scalar_prefetch = 0 : i64, scratch_operands = 0 : i64, tpu.core_type = #tpu.core_type<tc>, window_params = [{transform_indices = @transform_0, window_bounds = array<i64: 16, 512>}, {pipeline_mode = #tpu.pipeline_mode<synchronous>, transform_indices = @transform_1, window_bounds = array<i64: 512, 256>}, {pipeline_mode = #tpu.pipeline_mode<synchronous>, transform_indices = @transform_2, window_bounds = array<i64: 1, 256>}, {pipeline_mode = #tpu.pipeline_mode<synchronous>, transform_indices = @transform_3, window_bounds = array<i64: 256, 128>}, {pipeline_mode = #tpu.pipeline_mode<synchronous>, transform_indices = @transform_4, window_bounds = array<i64: 1, 128>}, {pipeline_mode = #tpu.pipeline_mode<synchronous>, transform_indices = @transform_5, window_bounds = array<i64: 128, 128>}, {pipeline_mode = #tpu.pipeline_mode<synchronous>, transform_indices = @transform_6, window_bounds = array<i64: 1, 128>}, {transform_indices = @transform_7, window_bounds = array<i64: 16, 128>}]} {
    %c0 = arith.constant 0 : index
    %c0_0 = arith.constant 0 : index
    %0 = vector.load %arg1[%c0, %c0_0] : memref<16x512xf32, #tpu.memory_space<vmem>>, vector<16x512xf32>
    %1 = arith.truncf %0 : vector<16x512xf32> to vector<16x512xbf16>
    %c0_1 = arith.constant 0 : index
    %c0_2 = arith.constant 0 : index
    %2 = vector.load %arg2[%c0_1, %c0_2] : memref<512x256xbf16, #tpu.memory_space<vmem>>, vector<512x256xbf16>
    %cst = arith.constant dense<0.000000e+00> : vector<16x256xf32>
    %3 = tpu.matmul %1, %2, %cst {dimension_numbers = #tpu.dot_dimension_numbers<[1], [0], [0], [1], [0, 0, 1, 1], [], []>} : vector<16x512xbf16>, vector<512x256xbf16>, vector<16x256xf32> -> vector<16x256xf32>
    %c0_3 = arith.constant 0 : index
    %c0_4 = arith.constant 0 : index
    %4 = vector.load %arg3[%c0_3, %c0_4] : memref<1x256xf32, #tpu.memory_space<vmem>>, vector<1x256xf32>
    %5 = vector.broadcast %4 : vector<1x256xf32> to vector<16x256xf32>
    %6 = arith.addf %3, %5 : vector<16x256xf32>
    %cst_5 = arith.constant 0.000000e+00 : f32
    %7 = vector.broadcast %cst_5 : f32 to vector<16x256xf32>
    %8 = arith.maximumf %6, %7 : vector<16x256xf32>
    %9 = arith.truncf %8 : vector<16x256xf32> to vector<16x256xbf16>
    %c0_6 = arith.constant 0 : index
    %c0_7 = arith.constant 0 : index
    %10 = vector.load %arg4[%c0_6, %c0_7] : memref<256x128xbf16, #tpu.memory_space<vmem>>, vector<256x128xbf16>
    %cst_8 = arith.constant dense<0.000000e+00> : vector<16x128xf32>
    %11 = tpu.matmul %9, %10, %cst_8 {dimension_numbers = #tpu.dot_dimension_numbers<[1], [0], [0], [1], [0, 0, 1, 1], [], []>} : vector<16x256xbf16>, vector<256x128xbf16>, vector<16x128xf32> -> vector<16x128xf32>
    %c0_9 = arith.constant 0 : index
    %c0_10 = arith.constant 0 : index
    %12 = vector.load %arg5[%c0_9, %c0_10] : memref<1x128xf32, #tpu.memory_space<vmem>>, vector<1x128xf32>
    %13 = vector.broadcast %12 : vector<1x128xf32> to vector<16x128xf32>
    %14 = arith.addf %11, %13 : vector<16x128xf32>
    %cst_11 = arith.constant 0.000000e+00 : f32
    %15 = vector.broadcast %cst_11 : f32 to vector<16x128xf32>
    %16 = arith.maximumf %14, %15 : vector<16x128xf32>
    %17 = arith.truncf %16 : vector<16x128xf32> to vector<16x128xbf16>
    %c0_12 = arith.constant 0 : index
    %c0_13 = arith.constant 0 : index
    %18 = vector.load %arg6[%c0_12, %c0_13] : memref<128x128xbf16, #tpu.memory_space<vmem>>, vector<128x128xbf16>
    %cst_14 = arith.constant dense<0.000000e+00> : vector<16x128xf32>
    %19 = tpu.matmul %17, %18, %cst_14 {dimension_numbers = #tpu.dot_dimension_numbers<[1], [0], [0], [1], [0, 0, 1, 1], [], []>} : vector<16x128xbf16>, vector<128x128xbf16>, vector<16x128xf32> -> vector<16x128xf32>
    %c0_15 = arith.constant 0 : index
    %c0_16 = arith.constant 0 : index
    %20 = vector.load %arg7[%c0_15, %c0_16] : memref<1x128xf32, #tpu.memory_space<vmem>>, vector<1x128xf32>
    %21 = vector.broadcast %20 : vector<1x128xf32> to vector<16x128xf32>
    %22 = arith.addf %19, %21 : vector<16x128xf32>
    %cst_17 = arith.constant dense<0xFF800000> : vector<16xf32>
    %23 = vector.multi_reduction <maximumf>, %22, %cst_17 [1] : vector<16x128xf32> to vector<16xf32>
    %24 = vector.shape_cast %23 : vector<16xf32> to vector<16x1xf32>
    %25 = vector.broadcast %24 : vector<16x1xf32> to vector<16x128xf32>
    %26 = arith.subf %22, %25 : vector<16x128xf32>
    %27 = math.exp %26 : vector<16x128xf32>
    %cst_18 = arith.constant dense<0.000000e+00> : vector<16xf32>
    %28 = vector.multi_reduction <add>, %27, %cst_18 [1] : vector<16x128xf32> to vector<16xf32>
    %29 = vector.shape_cast %28 : vector<16xf32> to vector<16x1xf32>
    %30 = vector.broadcast %29 : vector<16x1xf32> to vector<16x128xf32>
    %31 = arith.divf %27, %30 : vector<16x128xf32>
    %32 = arith.truncf %31 : vector<16x128xf32> to vector<16x128xbf16>
    %c0_19 = arith.constant 0 : index
    %c0_20 = arith.constant 0 : index
    %33 = vector.load %arg8[%c0_19, %c0_20] : memref<16x128xbf16, #tpu.memory_space<vmem>>, vector<16x128xbf16>
    tpu.vector_store %arg8[%c0_19, %c0_20], %32 {strides = array<i32>} : memref<16x128xbf16, #tpu.memory_space<vmem>>, vector<16x128xbf16>,
    return
  }
  func.func @transform_0(%arg0: i32) -> (i32, i32) {
    %c0_i32 = arith.constant 0 : i32
    %c0_i32_0 = arith.constant 0 : i32
    return %arg0, %c0_i32 : i32, i32
  }
  func.func @transform_1(%arg0: i32) -> (i32, i32) {
    %c0_i32 = arith.constant 0 : i32
    %c0_i32_0 = arith.constant 0 : i32
    %c0_i32_1 = arith.constant 0 : i32
    return %c0_i32, %c0_i32_0 : i32, i32
  }
  func.func @transform_2(%arg0: i32) -> (i32, i32) {
    %c0_i32 = arith.constant 0 : i32
    %c0_i32_0 = arith.constant 0 : i32
    %c0_i32_1 = arith.constant 0 : i32
    return %c0_i32, %c0_i32_0 : i32, i32
  }
  func.func @transform_3(%arg0: i32) -> (i32, i32) {
    %c0_i32 = arith.constant 0 : i32
    %c0_i32_0 = arith.constant 0 : i32
    %c0_i32_1 = arith.constant 0 : i32
    return %c0_i32, %c0_i32_0 : i32, i32
  }
  func.func @transform_4(%arg0: i32) -> (i32, i32) {
    %c0_i32 = arith.constant 0 : i32
    %c0_i32_0 = arith.constant 0 : i32
    %c0_i32_1 = arith.constant 0 : i32
    return %c0_i32, %c0_i32_0 : i32, i32
  }
  func.func @transform_5(%arg0: i32) -> (i32, i32) {
    %c0_i32 = arith.constant 0 : i32
    %c0_i32_0 = arith.constant 0 : i32
    %c0_i32_1 = arith.constant 0 : i32
    return %c0_i32, %c0_i32_0 : i32, i32
  }
  func.func @transform_6(%arg0: i32) -> (i32, i32) {
    %c0_i32 = arith.constant 0 : i32
    %c0_i32_0 = arith.constant 0 : i32
    %c0_i32_1 = arith.constant 0 : i32
    return %c0_i32, %c0_i32_0 : i32, i32
  }
  func.func @transform_7(%arg0: i32) -> (i32, i32) {
    %c0_i32 = arith.constant 0 : i32
    %c0_i32_0 = arith.constant 0 : i32
    return %arg0, %c0_i32 : i32, i32
  }
}

</mosaic_0001>

<bundles_post_ra>
// kernel: tpu_custom_call.1
= control target key start
LH: loop header
LB: loop body
LE: loop exit
PB: predicated region body
PF: predicated region fallthrough
CT: control target
= control target key end

     0   :  { %12 = vsyncpa [#allocation3], 0  ;;  %s1406_s0 = inlined_call_operand.hbm [shape: f32[16,512], index: 0, kind: input, shape index: {}]   ;;  %s1407_s1 = inlined_call_operand.hbm [shape: bf16[512,256], index: 1, kind: input, shape index: {}]   ;;  %s1408_s2 = inlined_call_operand.vmem [shape: f32[1,256], index: 2, kind: input, shape index: {}]   ;;  %s1409_s3 = inlined_call_operand.hbm [shape: bf16[256,128], index: 3, kind: input, shape index: {}]   ;;  %s1410_s4 = inlined_call_operand.vmem [shape: f32[1,128], index: 4, kind: input, shape index: {}]   ;;  %s1411_s5 = inlined_call_operand.hbm [shape: bf16[128,128], index: 5, kind: input, shape index: {}]   ;;  %s1412_s6 = inlined_call_operand.vmem [shape: f32[1,128], index: 6, kind: input, shape index: {}]   ;;  %s1413_s7 = inlined_call_operand.hbm [shape: bf16[16,128], index: 7, kind: output, shape index: {}]  }
   0x1   :  { %13 = vsyncpa [#allocation6], 0 }
   0x2   :  { %14 = vsyncpa [#allocation9], 0 }
   0x3   :  { %15 = vsyncpa [#allocation4], 0  ;;  %s1320_s24 = smov [#allocation5]  }
   0x4   :  { %s33_s25 = sshll.u32 %s1320_s24, 4  ;;  %s34_s25 = int_to_ptr.vmem [resolvable:$true] %s33_s25 }
   0x5   :  { %s1220_s26 = scalar_lea.vmem %s34_s25, 8192  ;;  %p1225_p1 = scmp.lt.s32.totalorder %s34_s25, %s34_s25 }
   0x6   :  { %p1221_p0 = scmp.ne.s32.totalorder %s34_s25, %s1220_s26  ;;  %p1226_p2 = scmp.lt.s32.totalorder %s1220_s26, %s1220_s26 }
   0x8   :  { %p1227_p3 = por %p1226_p2, %p1225_p1 }
   0xa   :  { %p1228_p4 = pnand %p1227_p3, %p1221_p0 }
   0xc   :  { %1231 = shalt.err (!%p1228_p4)
}
   0xd   :  { %s1321_s27 = smov 128   ;;  %s1322_s28 = smov 8  }
   0xe   :  { %39 = dma.hbm_to_vmem [thread:$0]  %s1407_s1, 8192, %s34_s25, [#allocation6], %s1321_s27, %s1321_s27, %s1322_s28  }
   0xf   :  { %s1323_s8 = smov [#allocation2]  }
  0x10   :  { %s21_s9 = sshll.u32 %s1323_s8, 4  ;;  %s22_s9 = int_to_ptr.vmem [resolvable:$true] %s21_s9 }
  0x11   :  { %s1240_s10 = scalar_lea.vmem %s22_s9, 1024  ;;  %p1245_p6 = scmp.lt.s32.totalorder %s22_s9, %s22_s9 }
  0x12   :  { %p1241_p5 = scmp.ne.s32.totalorder %s22_s9, %s1240_s10  ;;  %p1246_p7 = scmp.lt.s32.totalorder %s1240_s10, %s1240_s10 }
  0x14   :  { %p1247_p8 = por %p1246_p7, %p1245_p6 }
  0x16   :  { %p1248_p9 = pnand %p1247_p8, %p1241_p5 }
  0x18   :  { %1251 = shalt.err (!%p1248_p9)
}
  0x19   :  { %s1324_s11 = smov 512   ;;  %s1325_s12 = smov 32  }
  0x1a   :  { %27 = dma.hbm_to_vmem [thread:$0]  %s1406_s0, 1024, %s22_s9, [#allocation3], %s1324_s11, %s1324_s11, %s1325_s12  }
  0x1b   :  { %s1326_s15 = smov [#allocation7]  }
  0x1c   :  { %s47_s16 = sshll.u32 %s1326_s15, 4  ;;  %s48_s16 = int_to_ptr.vmem [resolvable:$true] %s47_s16 }
  0x1d   :  { %s1260_s1 = scalar_lea.vmem %s48_s16, 2048  ;;  %p1265_p11 = scmp.lt.s32.totalorder %s48_s16, %s48_s16 }
  0x1e   :  { %p1261_p10 = scmp.ne.s32.totalorder %s48_s16, %s1260_s1  ;;  %p1266_p12 = scmp.lt.s32.totalorder %s1260_s1, %s1260_s1 }
  0x20   :  { %p1267_p13 = por %p1266_p12, %p1265_p11 }
  0x22   :  { %p1268_p0 = pnand %p1267_p13, %p1261_p10 }
  0x24   :  { %1271 = shalt.err (!%p1268_p0)
}
  0x25   :  { %s1327_s17 = smov 64   ;;  %s1328_s18 = smov 4  }
  0x26   :  { %53 = dma.hbm_to_vmem [thread:$0]  %s1409_s3, 2048, %s48_s16, [#allocation6], %s1327_s17, %s1327_s17, %s1328_s18  }
  0x27   :  { %s1329_s0 = smov [#allocation8]  }
  0x28   :  { %s61_s21 = sshll.u32 %s1329_s0, 4  ;;  %s62_s21 = int_to_ptr.vmem [resolvable:$true] %s61_s21 }
  0x29   :  { %s1280_s22 = scalar_lea.vmem %s62_s21, 1024  ;;  %p1285_p2 = scmp.lt.s32.totalorder %s62_s21, %s62_s21 }
  0x2a   :  { %p1281_p1 = scmp.ne.s32.totalorder %s62_s21, %s1280_s22  ;;  %p1286_p3 = scmp.lt.s32.totalorder %s1280_s22, %s1280_s22 }
  0x2c   :  { %p1287_p4 = por %p1286_p3, %p1285_p2 }
  0x2e   :  { %p1288_p5 = pnand %p1287_p4, %p1281_p1 }
  0x30   :  { %1291 = shalt.err (!%p1288_p5)
}
  0x31   :  { %67 = dma.hbm_to_vmem [thread:$0]  %s1411_s5, 1024, %s62_s21, [#allocation9], %s1327_s17, %s1327_s17, %s1328_s18  }
  0x32   :  { %1312 = dma.done.wait [#allocation3], 1024  }
  0x33   :  { %1313 = vsyncadd [#allocation3], 4294966272 }
  0x34   :  { %1314 = dma.done.wait [#allocation6], 10240  }
  0x35   :  { %1315 = vsyncadd [#allocation6], 4294957056 }
  0x36   :  { %1316 = dma.done.wait [#allocation9], 1024  }
  0x37   :  { %1317 = vsyncadd [#allocation9], 4294966272  ;;  %v1084_v0 = vld [vmem:[#allocation5 + $0x74] ss:$8 sps:$4 sm:$0xff]   ;;  %v1088_v2 = vld [vmem:[#allocation5 + $0x70] ss:$8 sps:$4 sm:$0xff]  }
  0x38   :  { %v1086_v1 = vld [vmem:[#allocation5 + $0x174] ss:$8 sps:$4 sm:$0xff]   ;;  %491 = vmatprep.subr.bf16.mxu0 %v1084_v0  ;;  %v1089_v3 = vld [vmem:[#allocation5 + $0x170] ss:$8 sps:$4 sm:$0xff]   ;;  %v1090_v4 = vld [vmem:[#allocation5 + $0x64] ss:$8 sps:$4 sm:$0xff]  }
  0x39   :  { %534 = vmatprep.subr.bf16.mxu1 %v1086_v1  ;;  %492 = vmatpush1.bf16.msra.mxu0 %v1088_v2  ;;  %v1092_v5 = vld [vmem:[#allocation5 + $0x164] ss:$8 sps:$4 sm:$0xff]   ;;  %v1094_v6 = vld [vmem:[#allocation5 + $0x60] ss:$8 sps:$4 sm:$0xff]   ;;  %v1096_v8 = vld [vmem:[#allocation5 + $0x54] ss:$8 sps:$4 sm:$0xff]  }
  0x3a   :  { %535 = vmatpush1.bf16.msra.mxu1 %v1089_v3  ;;  %493 = vmatprep.subr.bf16.mxu0 %v1090_v4  ;;  %v1095_v7 = vld [vmem:[#allocation5 + $0x160] ss:$8 sps:$4 sm:$0xff]   ;;  %v1098_v9 = vld [vmem:[#allocation5 + $0x154] ss:$8 sps:$4 sm:$0xff]   ;;  %v1100_v10 = vld [vmem:[#allocation5 + $0x50] ss:$8 sps:$4 sm:$0xff]  }
  0x3b   :  { %536 = vmatprep.subr.bf16.mxu1 %v1092_v5  ;;  %v1101_v11 = vld [vmem:[#allocation5 + $0x150] ss:$8 sps:$4 sm:$0xff]   ;;  %v1102_v12 = vld [vmem:[#allocation5 + $0x44] ss:$8 sps:$4 sm:$0xff]   ;;  %v1106_v14 = vld [vmem:[#allocation5 + $0x40] ss:$8 sps:$4 sm:$0xff]  }
  0x3c   :  { %v1104_v13 = vld [vmem:[#allocation5 + $0x144] ss:$8 sps:$4 sm:$0xff]   ;;  %v1107_v15 = vld [vmem:[#allocation5 + $0x140] ss:$8 sps:$4 sm:$0xff]   ;;  %v1108_v16 = vld [vmem:[#allocation5 + $0x34] ss:$8 sps:$4 sm:$0xff]  }
  0x3d   :  { %494 = vmatpush1.bf16.msra.mxu0 %v1094_v6  ;;  %v1110_v17 = vld [vmem:[#allocation5 + $0x134] ss:$8 sps:$4 sm:$0xff]   ;;  %v1112_v18 = vld [vmem:[#allocation5 + $0x30] ss:$8 sps:$4 sm:$0xff]   ;;  %v1114_v20 = vld [vmem:[#allocation5 + $0x24] ss:$8 sps:$4 sm:$0xff]  }
  0x3e   :  { %537 = vmatpush1.bf16.msra.mxu1 %v1095_v7  ;;  %495 = vmatprep.subr.bf16.mxu0 %v1096_v8  ;;  %v1113_v19 = vld [vmem:[#allocation5 + $0x130] ss:$8 sps:$4 sm:$0xff]   ;;  %v1116_v21 = vld [vmem:[#allocation5 + $0x124] ss:$8 sps:$4 sm:$0xff]   ;;  %v1118_v22 = vld [vmem:[#allocation5 + $0x20] ss:$8 sps:$4 sm:$0xff]  }
  0x3f   :  { %538 = vmatprep.subr.bf16.mxu1 %v1098_v9  ;;  %v1119_v23 = vld [vmem:[#allocation5 + $0x120] ss:$8 sps:$4 sm:$0xff]   ;;  %v1120_v24 = vld [vmem:[#allocation5 + $0x14] ss:$8 sps:$4 sm:$0xff]   ;;  %v1124_v26 = vld [vmem:[#allocation5 + $0x10] ss:$8 sps:$4 sm:$0xff]  }
  0x40   :  { %v1122_v25 = vld [vmem:[#allocation5 + $0x114] ss:$8 sps:$4 sm:$0xff]   ;;  %v1125_v27 = vld [vmem:[#allocation5 + $0x110] ss:$8 sps:$4 sm:$0xff]   ;;  %v1126_v28 = vld [vmem:[#allocation5 + $0x4] ss:$8 sps:$4 sm:$0xff]  }
  0x41   :  { %496 = vmatpush1.bf16.msra.mxu0 %v1100_v10  ;;  %v1128_v29 = vld [vmem:[#allocation5 + $0x104] ss:$8 sps:$4 sm:$0xff]   ;;  %v1130_v30 = vld [vmem:[#allocation5] ss:$8 sps:$4 sm:$0xff]   ;;  %v1132_v32 = vld [vmem:[#allocation5 + $0xf4] ss:$8 sps:$4 sm:$0xff]  }
  0x42   :  { %539 = vmatpush1.bf16.msra.mxu1 %v1101_v11  ;;  %497 = vmatprep.subr.bf16.mxu0 %v1102_v12  ;;  %v1131_v31 = vld [vmem:[#allocation5 + $0x100] ss:$8 sps:$4 sm:$0xff]   ;;  %v1134_v33 = vld [vmem:[#allocation5 + $0x1f4] ss:$8 sps:$4 sm:$0xff]   ;;  %v1136_v34 = vld [vmem:[#allocation5 + $0xf0] ss:$8 sps:$4 sm:$0xff]  }
  0x43   :  { %540 = vmatprep.subr.bf16.mxu1 %v1104_v13  ;;  %v1137_v35 = vld [vmem:[#allocation5 + $0x1f0] ss:$8 sps:$4 sm:$0xff]   ;;  %v1138_v36 = vld [vmem:[#allocation5 + $0xe4] ss:$8 sps:$4 sm:$0xff]   ;;  %v1142_v38 = vld [vmem:[#allocation5 + $0xe0] ss:$8 sps:$4 sm:$0xff]  }
  0x44   :  { %v1140_v37 = vld [vmem:[#allocation5 + $0x1e4] ss:$8 sps:$4 sm:$0xff]   ;;  %v1143_v39 = vld [vmem:[#allocation5 + $0x1e0] ss:$8 sps:$4 sm:$0xff]   ;;  %v1144_v40 = vld [vmem:[#allocation5 + $0xd4] ss:$8 sps:$4 sm:$0xff]  }
  0x45   :  { %498 = vmatpush1.bf16.msra.mxu0 %v1106_v14  ;;  %v1146_v41 = vld [vmem:[#allocation5 + $0x1d4] ss:$8 sps:$4 sm:$0xff]   ;;  %v1148_v42 = vld [vmem:[#allocation5 + $0xd0] ss:$8 sps:$4 sm:$0xff]   ;;  %v1150_v44 = vld [vmem:[#allocation5 + $0xc4] ss:$8 sps:$4 sm:$0xff]  }
  0x46   :  { %541 = vmatpush1.bf16.msra.mxu1 %v1107_v15  ;;  %499 = vmatprep.subr.bf16.mxu0 %v1108_v16  ;;  %v1149_v43 = vld [vmem:[#allocation5 + $0x1d0] ss:$8 sps:$4 sm:$0xff]   ;;  %v1152_v45 = vld [vmem:[#allocation5 + $0x1c4] ss:$8 sps:$4 sm:$0xff]   ;;  %v1154_v50 = vld [vmem:[#allocation5 + $0xc0] ss:$8 sps:$4 sm:$0xff]  }
  0x47   :  { %542 = vmatprep.subr.bf16.mxu1 %v1110_v17  ;;  %v84_v46 = vld [vmem:[#allocation2 + $0x8] sm:$0xff]  ;;  %v86_v48 = vld [vmem:[#allocation2 + $0x18] sm:$0xff]  ;;  %v83_v6 = vld [vmem:[#allocation2] sm:$0xff]  ;;  %vm1331_vm0 = vmmov 0  }
  0x48   :  { %v88_v47 = vld [vmem:[#allocation2 + $0x28] sm:$0xff]  ;;  %v90_v49 = vld [vmem:[#allocation2 + $0x38] sm:$0xff]  ;;  %v87_v7 = vld [vmem:[#allocation2 + $0x20] sm:$0xff] }
  0x49   :  { %500 = vmatpush1.bf16.msra.mxu0 %v1112_v18  ;;  %v1155_v51 = vld [vmem:[#allocation5 + $0x1c0] ss:$8 sps:$4 sm:$0xff]   ;;  %v1156_v52 = vld [vmem:[#allocation5 + $0xb4] ss:$8 sps:$4 sm:$0xff]   ;;  %v92_v53 = vpack.c.bf16 %v88_v47, %v84_v46  ;;  %v94_v54 = vpack.c.bf16 %v90_v49, %v86_v48  ;;  %v1160_v56 = vld [vmem:[#allocation5 + $0xb0] ss:$8 sps:$4 sm:$0xff]   ;;  %v91_v11 = vpack.c.bf16 %v87_v7, %v83_v6 }
  0x4a   :  { %543 = vmatpush1.bf16.msra.mxu1 %v1113_v19  ;;  %501 = vmatprep.subr.bf16.mxu0 %v1114_v20  ;;  %v1158_v55 = vld [vmem:[#allocation5 + $0x1b4] ss:$8 sps:$4 sm:$0xff]   ;;  %v1161_v57 = vld [vmem:[#allocation5 + $0x1b0] ss:$8 sps:$4 sm:$0xff]   ;;  %v1162_v58 = vld [vmem:[#allocation5 + $0xa4] ss:$8 sps:$4 sm:$0xff]  }
  0x4b   :  { %544 = vmatprep.subr.bf16.mxu1 %v1116_v21  ;;  %523 = vmatprep.mubr.bf16.mxu0 %v92_v53  ;;  %v1164_v59 = vld [vmem:[#allocation5 + $0x1a4] ss:$8 sps:$4 sm:$0xff]   ;;  %v1166_v60 = vld [vmem:[#allocation5 + $0xa0] ss:$8 sps:$4 sm:$0xff]   ;;  %v1168_v62 = vld [vmem:[#allocation5 + $0x94] ss:$8 sps:$4 sm:$0xff]  }
  0x4c   :  { %566 = vmatprep.mubr.bf16.mxu1 %v94_v54  ;;  %v1167_v61 = vld [vmem:[#allocation5 + $0x1a0] ss:$8 sps:$4 sm:$0xff]   ;;  %v1170_v63 = vld [vmem:[#allocation5 + $0x194] ss:$8 sps:$4 sm:$0xff]   ;;  %v1172_v0 = vld [vmem:[#allocation5 + $0x90] ss:$8 sps:$4 sm:$0xff]  }
  0x4d   :  { %502 = vmatpush1.bf16.msra.mxu0 %v1118_v22  ;;  %v1173_v1 = vld [vmem:[#allocation5 + $0x190] ss:$8 sps:$4 sm:$0xff]   ;;  %v1174_v2 = vld [vmem:[#allocation5 + $0x84] ss:$8 sps:$4 sm:$0xff]   ;;  %v1178_v4 = vld [vmem:[#allocation5 + $0x80] ss:$8 sps:$4 sm:$0xff]  }
  0x4e   :  { %545 = vmatpush1.bf16.msra.mxu1 %v1119_v23  ;;  %503 = vmatprep.subr.bf16.mxu0 %v1120_v24  ;;  %v1176_v3 = vld [vmem:[#allocation5 + $0x184] ss:$8 sps:$4 sm:$0xff]   ;;  %v1179_v5 = vld [vmem:[#allocation5 + $0x180] ss:$8 sps:$4 sm:$0xff]   ;;  %v85_v8 = vld [vmem:[#allocation2 + $0x10] sm:$0xff] }
  0x4f   :  { %546 = vmatprep.subr.bf16.mxu1 %v1122_v25  ;;  %v89_v9 = vld [vmem:[#allocation2 + $0x30] sm:$0xff]  ;;  %v1180_v10 = vld [vmem:[#allocation7 + $0x78] sm:$0xff]   ;;  %v1184_v16 = vld [vmem:[#allocation7 + $0x68] sm:$0xff]  }
  0x50   :  { %v93_v12 = vpack.c.bf16 %v89_v9, %v85_v8  ;;  %v1181_v13 = vld [vmem:[#allocation7 + $0x38] sm:$0xff]   ;;  %v1182_v14 = vld [vmem:[#allocation7 + $0x70] sm:$0xff]   ;;  %v1185_v17 = vld [vmem:[#allocation7 + $0x28] sm:$0xff]  }
  0x51   :  { %504 = vmatpush1.bf16.msra.mxu0 %v1124_v26  ;;  %v1183_v15 = vld [vmem:[#allocation7 + $0x30] sm:$0xff]   ;;  %v1186_v18 = vld [vmem:[#allocation7 + $0x60] sm:$0xff]   ;;  %v1188_v20 = vld [vmem:[#allocation7 + $0x58] sm:$0xff]  }
  0x52   :  { %547 = vmatpush1.bf16.msra.mxu1 %v1125_v27  ;;  %505 = vmatprep.subr.bf16.mxu0 %v1126_v28  ;;  %v1187_v19 = vld [vmem:[#allocation7 + $0x20] sm:$0xff]   ;;  %v1189_v21 = vld [vmem:[#allocation7 + $0x18] sm:$0xff]   ;;  %v1190_v22 = vld [vmem:[#allocation7 + $0x50] sm:$0xff]  }
  0x53   :  { %548 = vmatprep.subr.bf16.mxu1 %v1128_v29  ;;  %v1191_v23 = vld [vmem:[#allocation7 + $0x10] sm:$0xff]   ;;  %v1192_v24 = vld [vmem:[#allocation7 + $0x48] sm:$0xff]   ;;  %v1194_v26 = vld [vmem:[#allocation7 + $0x40] sm:$0xff]   ;;  %v1330_v29 = vmov 0.0  }
  0x54   :  { %v1193_v25 = vld [vmem:[#allocation7 + $0x8] sm:$0xff]   ;;  %v1195_v27 = vld [vmem:[#allocation7] sm:$0xff]   ;;  %v1196_v28 = vld [vmem:[#allocation8 + $0x38] sm:$0xff]  }
  0x55   :  { %506 = vmatpush1.bf16.msra.mxu0 %v1130_v30  ;;  %v1197_v30 = vld [vmem:[#allocation8 + $0x30] sm:$0xff]  }
  0x56   :  { %549 = vmatpush1.bf16.msra.mxu1 %v1131_v31  ;;  %507 = vmatprep.subr.bf16.mxu0 %v1132_v32  ;;  %v1198_v31 = vld [vmem:[#allocation8 + $0x28] sm:$0xff]   ;;  %v1199_v32 = vld [vmem:[#allocation8 + $0x20] sm:$0xff]  }
  0x57   :  { %550 = vmatprep.subr.bf16.mxu1 %v1134_v33  ;;  %v161_v33 = vlaneseq }
  0x59   :  { %508 = vmatpush2.bf16.msra.mxu0 %v1136_v34  ;;  %v162_v34 = vshrl.u32 %v161_v33, 7 }
  0x5a   :  { %551 = vmatpush2.bf16.msra.mxu1 %v1137_v35  ;;  %509 = vmatprep.subr.bf16.mxu0 %v1138_v36 }
  0x5b   :  { %552 = vmatprep.subr.bf16.mxu1 %v1140_v37  ;;  %v167_v35 = vsub.s32 1, %v162_v34  ;;  %v163_v36 = vsub.s32 0, %v162_v34  ;;  %v159_v37 = vld [vmem:[%s1408_s2] sm:$0x3] }
  0x5d   :  { %510 = vmatpush2.bf16.msra.mxu0 %v1142_v38  ;;  %v168_v38 = vrot.slane %v159_v37, %v167_v35 }
  0x5e   :  { %553 = vmatpush2.bf16.msra.mxu1 %v1143_v39  ;;  %511 = vmatprep.subr.bf16.mxu0 %v1144_v40  ;;  %v164_v39 = vrot.slane %v159_v37, %v163_v36 }
  0x5f   :  { %554 = vmatprep.subr.bf16.mxu1 %v1146_v41 }
  0x61   :  { %512 = vmatpush2.bf16.msra.mxu0 %v1148_v42 }
  0x62   :  { %555 = vmatpush2.bf16.msra.mxu1 %v1149_v43  ;;  %513 = vmatprep.subr.bf16.mxu0 %v1150_v44 }
  0x63   :  { %556 = vmatprep.subr.bf16.mxu1 %v1152_v45 }
  0x65   :  { %514 = vmatpush2.bf16.msra.mxu0 %v1154_v50 }
  0x66   :  { %557 = vmatpush2.bf16.msra.mxu1 %v1155_v51  ;;  %515 = vmatprep.subr.bf16.mxu0 %v1156_v52 }
  0x67   :  { %558 = vmatprep.subr.bf16.mxu1 %v1158_v55 }
  0x69   :  { %516 = vmatpush2.bf16.msra.mxu0 %v1160_v56 }
  0x6a   :  { %559 = vmatpush2.bf16.msra.mxu1 %v1161_v57  ;;  %517 = vmatprep.subr.bf16.mxu0 %v1162_v58 }
  0x6b   :  { %560 = vmatprep.subr.bf16.mxu1 %v1164_v59 }
  0x6d   :  { %518 = vmatpush2.bf16.msra.mxu0 %v1166_v60 }
  0x6e   :  { %561 = vmatpush2.bf16.msra.mxu1 %v1167_v61  ;;  %519 = vmatprep.subr.bf16.mxu0 %v1168_v62  ;;  %v1200_v62 = vld [vmem:[#allocation8 + $0x18] sm:$0xff]  }
  0x6f   :  { %562 = vmatprep.subr.bf16.mxu1 %v1170_v63  ;;  %v1201_v63 = vld [vmem:[#allocation8 + $0x10] sm:$0xff]  }
  0x71   :  { %520 = vmatpush2.bf16.msra.mxu0 %v1172_v0  ;;  %v1202_v0 = vld [vmem:[#allocation8 + $0x8] sm:$0xff]  }
  0x72   :  { %563 = vmatpush2.bf16.msra.mxu1 %v1173_v1  ;;  %521 = vmatprep.subr.bf16.mxu0 %v1174_v2  ;;  %v1203_v1 = vld [vmem:[#allocation8] sm:$0xff]  }
  0x73   :  { %564 = vmatprep.subr.bf16.mxu1 %v1176_v3 }
  0x75   :  { %522 = vmatpush2.bf16.msra.mxu0 %v1178_v4 }
  0x76   :  { %565 = vmatpush2.bf16.msra.mxu1 %v1179_v5  ;;  %1020 = vmatprep.subr.bf16.mxu0 %v1180_v10  ;;  %v985_v5 = vld [vmem:[%s1410_s4] ss:$0 sm:$0xff]  ;;  %s1332_s4 = smov [#allocation10]  }
  0x77   :  { %1051 = vmatprep.subr.bf16.mxu1 %v1330_v29 }
  0x78   :  { %524 = vmatmul.mubr.bf16.vlgmr.msra.gmra.mxu0 %v91_v11 }
  0x79   :  { %567 = vmatmul.mubr.bf16.vlgmr.msra.gmra.mxu1 %v93_v12  ;;  %1021 = vmatpush3.bf16.msra.mxu0 %v1181_v13 }
  0x7a   :  { %1022 = vmatprep.subr.bf16.mxu0 %v1182_v14  ;;  %1052 = vmatpush3.bf16.msra.mxu1 %v1196_v28  ;;  %v1002_v14 = vld [vmem:[%s1412_s6] ss:$0 sm:$0xff]  ;;  %s907_s6 = sshll.u32 %s1332_s4, 4  ;;  %s908_s6 = int_to_ptr.vmem [resolvable:$true] %s907_s6 }
  0x7b   :  { %1053 = vmatprep.subr.bf16.mxu1 %v1330_v29  ;;  %1067 = vmatprep.mubr.msk.bf16.mxu1 %vm1331_vm0, %v1330_v29  ;;  %s1292_s28 = scalar_lea.vmem %s908_s6, 128  ;;  %p1297_p7 = scmp.lt.s32.totalorder %s908_s6, %s908_s6 }
  0x7c   :  { %p1293_p6 = scmp.ne.s32.totalorder %s908_s6, %s1292_s28  ;;  %p1298_p8 = scmp.lt.s32.totalorder %s1292_s28, %s1292_s28 }
  0x7d   :  { %1023 = vmatpush3.bf16.msra.mxu0 %v1183_v15 }
  0x7e   :  { %1024 = vmatprep.subr.bf16.mxu0 %v1184_v16  ;;  %1054 = vmatpush3.bf16.msra.mxu1 %v1197_v30  ;;  %p1299_p9 = por %p1298_p8, %p1297_p7 }
  0x7f   :  { %1055 = vmatprep.subr.bf16.mxu1 %v1330_v29 }
  0x80   :  { %p1300_p10 = pnand %p1299_p9, %p1293_p6 }
  0x81   :  { %1025 = vmatpush3.bf16.msra.mxu0 %v1185_v17 }
  0x82   :  { %1026 = vmatprep.subr.bf16.mxu0 %v1186_v18  ;;  %1056 = vmatpush3.bf16.msra.mxu1 %v1198_v31 }
  0x83   :  { %1057 = vmatprep.subr.bf16.mxu1 %v1330_v29 }
  0x85   :  { %1027 = vmatpush3.bf16.msra.mxu0 %v1187_v19 }
  0x86   :  { %1028 = vmatprep.subr.bf16.mxu0 %v1188_v20  ;;  %1058 = vmatpush3.bf16.msra.mxu1 %v1199_v32 }
  0x87   :  { %1059 = vmatprep.subr.bf16.mxu1 %v1330_v29 }
  0x89   :  { %1029 = vmatpush3.bf16.msra.mxu0 %v1189_v21 }
  0x8a   :  { %1030 = vmatprep.subr.bf16.mxu0 %v1190_v22  ;;  %1060 = vmatpush3.bf16.msra.mxu1 %v1200_v62 }
  0x8b   :  { %1061 = vmatprep.subr.bf16.mxu1 %v1330_v29 }
  0x8d   :  { %1031 = vmatpush3.bf16.msra.mxu0 %v1191_v23 }
  0x8e   :  { %1032 = vmatprep.subr.bf16.mxu0 %v1192_v24  ;;  %1062 = vmatpush3.bf16.msra.mxu1 %v1201_v63 }
  0x8f   :  { %1063 = vmatprep.subr.bf16.mxu1 %v1330_v29 }
  0x91   :  { %1033 = vmatpush3.bf16.msra.mxu0 %v1193_v25 }
  0x92   :  { %1034 = vmatprep.subr.bf16.mxu0 %v1194_v26  ;;  %1064 = vmatpush3.bf16.msra.mxu1 %v1202_v0 }
  0x93   :  { %1065 = vmatprep.subr.bf16.mxu1 %v1330_v29 }
  0x95   :  { %1035 = vmatpush3.bf16.msra.mxu0 %v1195_v27 }
  0x96   :  { %1066 = vmatpush3.bf16.msra.mxu1 %v1203_v1 }
 0x138   :  { %v525_v40 = vpop.f32.mrf.mxu0 }
 0x139   :  { %v568_v41 = vpop.f32.mrf.mxu1  ;;  %v526_v45 = vadd.f32 %v525_v40, %v164_v39 }
 0x13a   :  { %v527_v42 = vpop.f32.mrf.mxu0 }
 0x13b   :  { %v570_v43 = vpop.f32.mrf.mxu1  ;;  %v528_v44 = vadd.f32 %v527_v42, %v168_v38  ;;  %v569_v53 = vadd.f32 %v568_v41, %v526_v45 }
 0x13c   :  { %v529_v46 = vpop.f32.mrf.mxu0 }
 0x13d   :  { %v572_v47 = vpop.f32.mrf.mxu1  ;;  %v530_v48 = vadd.f32 %v529_v46, %v164_v39  ;;  %v571_v50 = vadd.f32 %v570_v43, %v528_v44  ;;  %v577_v59 = vmax.f32 %v569_v53, 0.0 }
 0x13e   :  { %v531_v49 = vpop.f32.mrf.mxu0 }
 0x13f   :  { %v573_v51 = vadd.f32 %v572_v47, %v530_v48  ;;  %v532_v52 = vadd.f32 %v531_v49, %v168_v38  ;;  %v574_v54 = vpop.f32.mrf.mxu1  ;;  %v578_v57 = vmax.f32 %v571_v50, 0.0 }
 0x141   :  { %v575_v55 = vadd.f32 %v574_v54, %v532_v52  ;;  %v579_v56 = vmax.f32 %v573_v51, 0.0 }
 0x143   :  { %v580_v58 = vmax.f32 %v575_v55, 0.0  ;;  %v581_v61 = vpack.c.bf16 %v579_v56, %v577_v59 }
 0x145   :  { %v582_v60 = vpack.c.bf16 %v580_v58, %v578_v57 }
 0x147   :  { %750 = vmatprep.mubr.bf16.mxu0 %v582_v60 }
 0x148   :  { %751 = vmatmul.mubr.bf16.vlgmr.msra.gmra.mxu0 %v581_v61 }
 0x208   :  { %v1036_v2 = vpop.f32.mrf.mxu0 }
 0x20a   :  { %v1037_v3 = vpop.f32.mrf.mxu0 }
 0x20b   :  { %v1038_v4 = vadd.f32 %v1037_v3, %v1036_v2 }
 0x20c   :  { %v1039_v6 = vpop.f32.mrf.mxu0 }
 0x20d   :  { %v753_v8 = vadd.f32 %v1038_v4, %v985_v5 }
 0x20e   :  { %v1040_v7 = vpop.f32.mrf.mxu0 }
 0x20f   :  { %v1041_v9 = vadd.f32 %v1040_v7, %v1039_v6  ;;  %v759_v11 = vmax.f32 %v753_v8, 0.0 }
 0x211   :  { %v756_v10 = vadd.f32 %v1041_v9, %v985_v5 }
 0x213   :  { %v760_v12 = vmax.f32 %v756_v10, 0.0 }
 0x215   :  { %v761_v13 = vpack.c.bf16 %v760_v12, %v759_v11 }
 0x217   :  { %1068 = vmatmul.mubr.bf16.vlgmr.msra.gmra.mxu1 %v761_v13 }
 0x2d7   :  { %v867_v15 = vpop.f32.mrf.mxu1 }
 0x2d8   :  { %v868_v16 = vadd.f32 %v1002_v14, %v867_v15 }
 0x2d9   :  { %v1069_v17 = vpop.f32.mrf.mxu1 }
 0x2da   :  { %874 = vmax.xlane.f32.xlu0 %v868_v16 }
 0x2db   :  { %v870_v18 = vpop.f32.mrf.mxu1 }
 0x2dc   :  { %v871_v19 = vadd.f32 %v1002_v14, %v870_v18 }
 0x2dd   :  { %v1070_v20 = vpop.f32.mrf.mxu1 }
 0x2de   :  { %876 = vmax.xlane.f32.xlu0 %v871_v19 }
 0x363   :  { %v875_v21 = vpop.xlane.xlu0 %874 }
 0x364   :  { %v878_v22 = vsub.f32 %v868_v16, %v875_v21 }
 0x366   :  { %v880_v23 = vmul.f32 1.442695, %v878_v22 }
 0x367   :  { %v877_v24 = vpop.xlane.xlu0 %876 }
 0x368   :  { %1204 = vpow2.f32 %v880_v23  ;;  %v879_v25 = vsub.f32 %v871_v19, %v877_v24 }
 0x36a   :  { %v882_v26 = vmul.f32 1.442695, %v879_v25 }
 0x36c   :  { %1206 = vpow2.f32 %v882_v26 }
 0x375   :  { %v1205_v27 = vpop.eup %1204 }
 0x376   :  { %884 = vadd.xlane.f32.xlu1 %v1205_v27 }
 0x379   :  { %v1207_v28 = vpop.eup %1206 }
 0x37a   :  { %886 = vadd.xlane.f32.xlu1 %v1207_v28 }
 0x3ff   :  { %v885_v29 = vpop.xlane.xlu1 %884 }
 0x400   :  { %1208 = vrcp.f32 %v885_v29 }
 0x403   :  { %v887_v30 = vpop.xlane.xlu1 %886 }
 0x404   :  { %1210 = vrcp.f32 %v887_v30 }
 0x40d   :  { %v1209_v31 = vpop.eup %1208 }
 0x40e   :  { %v889_v33 = vmul.f32 %v1209_v31, %v1205_v27 }
 0x411   :  { %v1211_v32 = vpop.eup %1210 }
 0x412   :  { %v891_v34 = vmul.f32 %v1211_v32, %v1207_v28 }
 0x414   :  { %v1018_v35 = vpack.c.bf16 %v891_v34, %v889_v33 }
 0x416   :  { %1019 = vst [vmem:[#allocation10] sm:$0xff] %v1018_v35  }
 0x417   :  { %1303 = shalt.err (!%p1300_p10)
}
 0x418   :  { %913 = dma.vmem_to_hbm [thread:$0]  %s908_s6, 128, %s1413_s7, [#allocation4], %s1327_s17, %s1327_s17, %s1328_s18  }
 0x419   :  { %1318 = dma.done.wait [#allocation4], 128  }
 0x41a   :  { %1319 = vsyncadd [#allocation4], 4294967168 }
 0x41b   :  { %917 = vsyncpa [#allocation3], 1 }
 0x41c   :  { %918 = vsyncpa [#allocation6], 1 }
 0x41d   :  { %919 = vsyncpa [#allocation9], 1 }
 0x41e   :  { %920 = vsyncpa [#allocation4], 1 }

</bundles_post_ra>
